<compile_context>
chip_gen: v7x
topology: tpu7x:2x2x1
jax: 0.10.0
libtpu: 0.0.40
codegen_flags: <defaults>
</compile_context>

<pallas_src>
import functools

import numpy as np

import jax
import jax.numpy as jnp
from jax import lax
from jax.experimental import pallas as pl
from jax.experimental.pallas import tpu as pltpu


def _ds_conv_kernel(x_ref, wdw_ref, mask_ref, gb_ref, wpw_ref, out_ref, *,
                    H, W, KH, KW, pad, eps):
    # x_ref    : (Nb, Cin, H*W)      NCHW-native input block (spatial on lanes)
    # wdw_ref  : (KH*KW, Cin, 1)     depthwise weights (per-tap, per-channel)
    # mask_ref : (KH*KW, 1, H*W)     0/1 boundary masks per tap (f32)
    # gb_ref   : (2, Cin, 1)         instance-norm gamma / beta
    # wpw_ref  : (Cout, Cin)         pointwise weights
    # out_ref  : (Nb, Cout, H*W)     NCHW-native, lane-dense output block
    Nb = x_ref.shape[0]
    HW = H * W

    x = x_ref[...].astype(jnp.float32)               # (Nb, Cin, HW)
    wdw = wdw_ref[...].astype(jnp.float32)            # (KH*KW, Cin, 1)
    masks = mask_ref[...]                              # (KH*KW, 1, HW)

    # --- depthwise conv (stride=1, zero padding) -----------------------------
    # Each tap is a lane rotation of the flat H*W axis (XLU) times a masked
    # per-channel weight; boundary pixels are zeroed by the 0/1 mask.
    acc = x * wdw[pad * KW + pad]                      # center tap: no shift/mask
    for kh in range(KH):
        dh = kh - pad
        for kw in range(KW):
            dw = kw - pad
            if dh == 0 and dw == 0:
                continue
            t = kh * KW + kw
            s = dh * W + dw                            # read offset in flat H*W
            shifted = pltpu.roll(x, shift=(-s) % HW, axis=2)
            acc = acc + shifted * (wdw[t] * masks[t])  # (Nb,Cin,HW)

    # --- instance norm: one-pass stats (clamped variance), fused affine ------
    inv_hw = 1.0 / float(HW)
    mean = jnp.sum(acc, axis=2, keepdims=True) * inv_hw        # (Nb, Cin, 1)
    ex2 = jnp.sum(acc * acc, axis=2, keepdims=True) * inv_hw
    var = jnp.maximum(ex2 - mean * mean, 0.0)
    gamma = gb_ref[0].astype(jnp.float32)                      # (Cin, 1)
    beta = gb_ref[1].astype(jnp.float32)
    scale = lax.rsqrt(var + eps) * gamma                       # (Nb, Cin, 1)
    shift = beta - mean * scale
    xn = acc * scale + shift                                   # (Nb, Cin, HW)

    # --- pointwise 1x1 conv on the MXU ---------------------------------------
    # (Cout, Cin) @ (Cin, HW) per image; xn[n] is a leading-axis slice (no
    # relayout), stores are tile-aligned lane-dense (Cout, HW) slabs.
    wpw = wpw_ref[...].astype(jnp.float32)                     # (Cout, Cin)
    for n in range(Nb):
        y = lax.dot_general(
            wpw, xn[n],
            dimension_numbers=(((1,), (0,)), ((), ())),        # contract Cin
            preferred_element_type=jnp.float32)                # (Cout, HW)
        out_ref[n] = y.astype(out_ref.dtype)


def aconv2d_ds_forward(x_nchw, w_dw, gamma, beta, w_pw, *,
                       kernel_size=3, padding=1, eps=1e-5,
                       block_n=None, out_dtype=None):
    """x_nchw: (N, Cin, H, W); w_dw: (Cin, 1, K, K); gamma/beta: (Cin,);
    w_pw: (Cout, Cin, 1, 1).  Returns (N, Cout, H, W)."""
    N, Cin, H, W = x_nchw.shape
    Cout = w_pw.shape[0]
    KH = KW = kernel_size
    HW = H * W
    assert 2 * padding == KH - 1, "kernel assumes stride=1 with 'same'-style padding"
    out_dtype = jnp.dtype(out_dtype) if out_dtype is not None else x_nchw.dtype

    # NCHW-native: flat spatial axis on lanes.  All reshapes below are metadata.
    x_flat = x_nchw.reshape(N, Cin, HW)
    wdw = jnp.transpose(w_dw[:, 0, :, :].reshape(Cin, KH * KW), (1, 0))
    wdw = wdw.reshape(KH * KW, Cin, 1)
    gb = jnp.stack([gamma, beta], axis=0).reshape(2, Cin, 1)
    wpw = w_pw[:, :, 0, 0]                                    # (Cout, Cin)

    # Host-side 0/1 boundary masks per tap (compile-time constants, K*K*HW f32).
    hh, ww = np.meshgrid(np.arange(H), np.arange(W), indexing="ij")
    masks_np = np.empty((KH * KW, 1, HW), np.float32)
    for kh in range(KH):
        for kw in range(KW):
            dh, dw = kh - padding, kw - padding
            ok = ((hh + dh >= 0) & (hh + dh < H) &
                  (ww + dw >= 0) & (ww + dw < W))
            masks_np[kh * KW + kw, 0, :] = ok.reshape(-1).astype(np.float32)
    masks = jnp.asarray(masks_np)

    # --- device-aware block_n / VMEM budget ----------------------------------
    itemsize_in = x_nchw.dtype.itemsize
    itemsize_out = out_dtype.itemsize
    per_image = (2 * Cin * HW * itemsize_in          # double-buffered input blk
                 + 2 * Cout * HW * itemsize_out      # double-buffered output blk
                 + 3 * Cin * HW * 4)                 # live f32 temporaries
    weight_bytes = 2 * 4 * (KH * KW * (Cin + HW) + 2 * Cin + Cout * Cin)

    try:
        info = pltpu.get_tpu_info()
        vmem_cap = int(getattr(info, "vmem_capacity_bytes", 64 * 2 ** 20))
    except Exception:
        vmem_cap = 64 * 2 ** 20                      # conservative (v7x) fallback
    budget = (vmem_cap * 3) // 4

    if block_n is None:
        block_n = 1
        for cand in (16, 8, 4, 2, 1):
            if N % cand:
                continue
            if cand * per_image + weight_bytes > budget:
                continue
            if N >= 2 and N // cand < 2:
                continue   # keep >= 2 parallel grid steps (v7x has 2 TensorCores)
            block_n = cand
            break
    assert N % block_n == 0

    vmem_limit = int(min(int(vmem_cap * 0.9),
                         max(16 * 2 ** 20,
                             2 * (block_n * per_image + weight_bytes))))

    flops = N * HW * (2 * KH * KW * Cin + 8 * Cin + 2 * Cin * Cout)
    bytes_accessed = (x_nchw.size * itemsize_in
                      + N * Cout * HW * itemsize_out
                      + 4 * int(masks.size + wdw.size + gb.size + wpw.size))
    cost = pl.CostEstimate(flops=int(flops), transcendentals=int(N * Cin),
                           bytes_accessed=int(bytes_accessed))

    kernel = functools.partial(_ds_conv_kernel, H=H, W=W, KH=KH, KW=KW,
                               pad=padding, eps=eps)

    out_flat = pl.pallas_call(
        kernel,
        out_shape=jax.ShapeDtypeStruct((N, Cout, HW), out_dtype),
        grid_spec=pltpu.PrefetchScalarGridSpec(
            num_scalar_prefetch=0,
            grid=(N // block_n,),
            in_specs=[
                pl.BlockSpec((block_n, Cin, HW), lambda b: (b, 0, 0)),
                pl.BlockSpec((KH * KW, Cin, 1), lambda b: (0, 0, 0)),
                pl.BlockSpec((KH * KW, 1, HW), lambda b: (0, 0, 0)),
                pl.BlockSpec((2, Cin, 1), lambda b: (0, 0, 0)),
                pl.BlockSpec((Cout, Cin), lambda b: (0, 0)),
            ],
            out_specs=pl.BlockSpec((block_n, Cout, HW), lambda b: (b, 0, 0)),
        ),
        compiler_params=pltpu.CompilerParams(
            dimension_semantics=("parallel",),
            vmem_limit_bytes=vmem_limit),
        cost_estimate=cost,
    )(x_flat, wdw, masks, gb, wpw)

    # (N, Cout, H*W) -> (N, Cout, H, W): pure metadata reshape, no HBM transpose.
    return out_flat.reshape(N, Cout, H, W)


def _reference(x_nchw, w_dw, gamma, beta, w_pw, *, padding=1, eps=1e-5):
    """Pure-JAX f32 reference mirroring PyTorch semantics (NCHW)."""
    Cin = x_nchw.shape[1]
    dn = ("NCHW", "OIHW", "NCHW")
    y = lax.conv_general_dilated(
        x_nchw, w_dw, window_strides=(1, 1),
        padding=[(padding, padding), (padding, padding)],
        dimension_numbers=dn, feature_group_count=Cin,
        precision=lax.Precision.HIGHEST)
    mean = jnp.mean(y, axis=(2, 3), keepdims=True)
    var = jnp.mean((y - mean) ** 2, axis=(2, 3), keepdims=True)
    y = (y - mean) * lax.rsqrt(var + eps)
    y = y * gamma.reshape(1, Cin, 1, 1) + beta.reshape(1, Cin, 1, 1)
    y = lax.conv_general_dilated(
        y, w_pw, window_strides=(1, 1), padding=[(0, 0), (0, 0)],
        dimension_numbers=dn, precision=lax.Precision.HIGHEST)
    return y


if __name__ == "__main__":
    N, Cin, Cout, H, W, K = 2, 8, 16, 16, 16, 3

    key = jax.random.PRNGKey(0)
    k_x, k_dw, k_pw, k_g, k_b = jax.random.split(key, 5)

    x = jax.random.normal(k_x, (N, Cin, H, W), dtype=jnp.float32)
    # deterministic "synthetic" parameters (no checkpoint loading)
    w_dw = jax.random.normal(k_dw, (Cin, 1, K, K), dtype=jnp.float32) * 0.1
    w_pw = jax.random.normal(k_pw, (Cout, Cin, 1, 1), dtype=jnp.float32) * 0.1
    gamma = 1.0 + 0.05 * jax.random.normal(k_g, (Cin,), dtype=jnp.float32)
    beta = 0.05 * jax.random.normal(k_b, (Cin,), dtype=jnp.float32)

    out = aconv2d_ds_forward(x, w_dw, gamma, beta, w_pw,
                             kernel_size=K, padding=1)
    out = jax.block_until_ready(out)

    ref = _reference(x, w_dw, gamma, beta, w_pw, padding=1)
    assert out.shape == (N, Cout, H, W)
    # f32 all the way through (MXU f32 accumulation); tolerance covers summation
    # order / one-pass-variance differences while catching layout bugs (O(0.1+)).
    err = float(jnp.max(jnp.abs(out - ref)))
    assert jnp.allclose(out, ref, atol=2e-3, rtol=2e-3), (
        "mismatch vs reference, max abs err = %g" % err)

    print("KERNEL_OK")
</pallas_src>

<mosaic_0001>
module attributes {stable_mosaic.version = 11 : i64} {
  func.func @_ds_conv_kernel(%arg0: i32, %arg1: memref<1x8x256xf32, #tpu.memory_space<vmem>>, %arg2: memref<9x8x1xf32, #tpu.memory_space<vmem>>, %arg3: memref<9x1x256xf32, #tpu.memory_space<vmem>>, %arg4: memref<2x8x1xf32, #tpu.memory_space<vmem>>, %arg5: memref<16x8xf32, #tpu.memory_space<vmem>>, %arg6: memref<1x16x256xf32, #tpu.memory_space<vmem>>) attributes {dimension_semantics = [#tpu.dimension_semantics<parallel>], iteration_bounds = array<i64: 2>, scalar_prefetch = 0 : i64, scratch_operands = 0 : i64, tpu.core_type = #tpu.core_type<tc>, window_params = [{transform_indices = @transform_0, window_bounds = array<i64: 1, 8, 256>}, {pipeline_mode = #tpu.pipeline_mode<synchronous>, transform_indices = @transform_1, window_bounds = array<i64: 9, 8, 1>}, {pipeline_mode = #tpu.pipeline_mode<synchronous>, transform_indices = @transform_2, window_bounds = array<i64: 9, 1, 256>}, {pipeline_mode = #tpu.pipeline_mode<synchronous>, transform_indices = @transform_3, window_bounds = array<i64: 2, 8, 1>}, {pipeline_mode = #tpu.pipeline_mode<synchronous>, transform_indices = @transform_4, window_bounds = array<i64: 16, 8>}, {transform_indices = @transform_5, window_bounds = array<i64: 1, 16, 256>}]} {
    %c0 = arith.constant 0 : index
    %c0_0 = arith.constant 0 : index
    %c0_1 = arith.constant 0 : index
    %0 = vector.load %arg1[%c0, %c0_0, %c0_1] : memref<1x8x256xf32, #tpu.memory_space<vmem>>, vector<1x8x256xf32>
    %c0_2 = arith.constant 0 : index
    %c0_3 = arith.constant 0 : index
    %c0_4 = arith.constant 0 : index
    %1 = vector.load %arg2[%c0_2, %c0_3, %c0_4] : memref<9x8x1xf32, #tpu.memory_space<vmem>>, vector<9x8x1xf32>
    %c0_5 = arith.constant 0 : index
    %c0_6 = arith.constant 0 : index
    %c0_7 = arith.constant 0 : index
    %2 = vector.load %arg3[%c0_5, %c0_6, %c0_7] : memref<9x1x256xf32, #tpu.memory_space<vmem>>, vector<9x1x256xf32>
    %3 = vector.extract_strided_slice %1 {offsets = [4, 0, 0], sizes = [1, 8, 1], strides = [1, 1, 1]} : vector<9x8x1xf32> to vector<1x8x1xf32>
    %4 = vector.shape_cast %3 : vector<1x8x1xf32> to vector<8x1xf32>
    %5 = vector.shape_cast %4 : vector<8x1xf32> to vector<1x8x1xf32>
    %6 = vector.broadcast %5 : vector<1x8x1xf32> to vector<1x8x256xf32>
    %7 = arith.mulf %0, %6 : vector<1x8x256xf32>
    %c17_i32 = arith.constant 17 : i32
    %8 = tpu.dynamic_rotate %0 by %c17_i32 dim 2 : vector<1x8x256xf32>, i32 -> vector<1x8x256xf32>
    %9 = vector.extract_strided_slice %1 {offsets = [0, 0, 0], sizes = [1, 8, 1], strides = [1, 1, 1]} : vector<9x8x1xf32> to vector<1x8x1xf32>
    %10 = vector.shape_cast %9 : vector<1x8x1xf32> to vector<8x1xf32>
    %11 = vector.extract_strided_slice %2 {offsets = [0, 0, 0], sizes = [1, 1, 256], strides = [1, 1, 1]} : vector<9x1x256xf32> to vector<1x1x256xf32>
    %12 = vector.shape_cast %11 : vector<1x1x256xf32> to vector<1x256xf32>
    %13 = vector.broadcast %10 : vector<8x1xf32> to vector<8x256xf32>
    %14 = vector.broadcast %12 : vector<1x256xf32> to vector<8x256xf32>
    %15 = arith.mulf %13, %14 : vector<8x256xf32>
    %16 = vector.shape_cast %15 : vector<8x256xf32> to vector<1x8x256xf32>
    %17 = arith.mulf %8, %16 : vector<1x8x256xf32>
    %18 = arith.addf %7, %17 : vector<1x8x256xf32>
    %c16_i32 = arith.constant 16 : i32
    %19 = tpu.dynamic_rotate %0 by %c16_i32 dim 2 : vector<1x8x256xf32>, i32 -> vector<1x8x256xf32>
    %20 = vector.extract_strided_slice %1 {offsets = [1, 0, 0], sizes = [1, 8, 1], strides = [1, 1, 1]} : vector<9x8x1xf32> to vector<1x8x1xf32>
    %21 = vector.shape_cast %20 : vector<1x8x1xf32> to vector<8x1xf32>
    %22 = vector.extract_strided_slice %2 {offsets = [1, 0, 0], sizes = [1, 1, 256], strides = [1, 1, 1]} : vector<9x1x256xf32> to vector<1x1x256xf32>
    %23 = vector.shape_cast %22 : vector<1x1x256xf32> to vector<1x256xf32>
    %24 = vector.broadcast %21 : vector<8x1xf32> to vector<8x256xf32>
    %25 = vector.broadcast %23 : vector<1x256xf32> to vector<8x256xf32>
    %26 = arith.mulf %24, %25 : vector<8x256xf32>
    %27 = vector.shape_cast %26 : vector<8x256xf32> to vector<1x8x256xf32>
    %28 = arith.mulf %19, %27 : vector<1x8x256xf32>
    %29 = arith.addf %18, %28 : vector<1x8x256xf32>
    %c15_i32 = arith.constant 15 : i32
    %30 = tpu.dynamic_rotate %0 by %c15_i32 dim 2 : vector<1x8x256xf32>, i32 -> vector<1x8x256xf32>
    %31 = vector.extract_strided_slice %1 {offsets = [2, 0, 0], sizes = [1, 8, 1], strides = [1, 1, 1]} : vector<9x8x1xf32> to vector<1x8x1xf32>
    %32 = vector.shape_cast %31 : vector<1x8x1xf32> to vector<8x1xf32>
    %33 = vector.extract_strided_slice %2 {offsets = [2, 0, 0], sizes = [1, 1, 256], strides = [1, 1, 1]} : vector<9x1x256xf32> to vector<1x1x256xf32>
    %34 = vector.shape_cast %33 : vector<1x1x256xf32> to vector<1x256xf32>
    %35 = vector.broadcast %32 : vector<8x1xf32> to vector<8x256xf32>
    %36 = vector.broadcast %34 : vector<1x256xf32> to vector<8x256xf32>
    %37 = arith.mulf %35, %36 : vector<8x256xf32>
    %38 = vector.shape_cast %37 : vector<8x256xf32> to vector<1x8x256xf32>
    %39 = arith.mulf %30, %38 : vector<1x8x256xf32>
    %40 = arith.addf %29, %39 : vector<1x8x256xf32>
    %c1_i32 = arith.constant 1 : i32
    %41 = tpu.dynamic_rotate %0 by %c1_i32 dim 2 : vector<1x8x256xf32>, i32 -> vector<1x8x256xf32>
    %42 = vector.extract_strided_slice %1 {offsets = [3, 0, 0], sizes = [1, 8, 1], strides = [1, 1, 1]} : vector<9x8x1xf32> to vector<1x8x1xf32>
    %43 = vector.shape_cast %42 : vector<1x8x1xf32> to vector<8x1xf32>
    %44 = vector.extract_strided_slice %2 {offsets = [3, 0, 0], sizes = [1, 1, 256], strides = [1, 1, 1]} : vector<9x1x256xf32> to vector<1x1x256xf32>
    %45 = vector.shape_cast %44 : vector<1x1x256xf32> to vector<1x256xf32>
    %46 = vector.broadcast %43 : vector<8x1xf32> to vector<8x256xf32>
    %47 = vector.broadcast %45 : vector<1x256xf32> to vector<8x256xf32>
    %48 = arith.mulf %46, %47 : vector<8x256xf32>
    %49 = vector.shape_cast %48 : vector<8x256xf32> to vector<1x8x256xf32>
    %50 = arith.mulf %41, %49 : vector<1x8x256xf32>
    %51 = arith.addf %40, %50 : vector<1x8x256xf32>
    %c255_i32 = arith.constant 255 : i32
    %52 = tpu.dynamic_rotate %0 by %c255_i32 dim 2 : vector<1x8x256xf32>, i32 -> vector<1x8x256xf32>
    %53 = vector.extract_strided_slice %1 {offsets = [5, 0, 0], sizes = [1, 8, 1], strides = [1, 1, 1]} : vector<9x8x1xf32> to vector<1x8x1xf32>
    %54 = vector.shape_cast %53 : vector<1x8x1xf32> to vector<8x1xf32>
    %55 = vector.extract_strided_slice %2 {offsets = [5, 0, 0], sizes = [1, 1, 256], strides = [1, 1, 1]} : vector<9x1x256xf32> to vector<1x1x256xf32>
    %56 = vector.shape_cast %55 : vector<1x1x256xf32> to vector<1x256xf32>
    %57 = vector.broadcast %54 : vector<8x1xf32> to vector<8x256xf32>
    %58 = vector.broadcast %56 : vector<1x256xf32> to vector<8x256xf32>
    %59 = arith.mulf %57, %58 : vector<8x256xf32>
    %60 = vector.shape_cast %59 : vector<8x256xf32> to vector<1x8x256xf32>
    %61 = arith.mulf %52, %60 : vector<1x8x256xf32>
    %62 = arith.addf %51, %61 : vector<1x8x256xf32>
    %c241_i32 = arith.constant 241 : i32
    %63 = tpu.dynamic_rotate %0 by %c241_i32 dim 2 : vector<1x8x256xf32>, i32 -> vector<1x8x256xf32>
    %64 = vector.extract_strided_slice %1 {offsets = [6, 0, 0], sizes = [1, 8, 1], strides = [1, 1, 1]} : vector<9x8x1xf32> to vector<1x8x1xf32>
    %65 = vector.shape_cast %64 : vector<1x8x1xf32> to vector<8x1xf32>
    %66 = vector.extract_strided_slice %2 {offsets = [6, 0, 0], sizes = [1, 1, 256], strides = [1, 1, 1]} : vector<9x1x256xf32> to vector<1x1x256xf32>
    %67 = vector.shape_cast %66 : vector<1x1x256xf32> to vector<1x256xf32>
    %68 = vector.broadcast %65 : vector<8x1xf32> to vector<8x256xf32>
    %69 = vector.broadcast %67 : vector<1x256xf32> to vector<8x256xf32>
    %70 = arith.mulf %68, %69 : vector<8x256xf32>
    %71 = vector.shape_cast %70 : vector<8x256xf32> to vector<1x8x256xf32>
    %72 = arith.mulf %63, %71 : vector<1x8x256xf32>
    %73 = arith.addf %62, %72 : vector<1x8x256xf32>
    %c240_i32 = arith.constant 240 : i32
    %74 = tpu.dynamic_rotate %0 by %c240_i32 dim 2 : vector<1x8x256xf32>, i32 -> vector<1x8x256xf32>
    %75 = vector.extract_strided_slice %1 {offsets = [7, 0, 0], sizes = [1, 8, 1], strides = [1, 1, 1]} : vector<9x8x1xf32> to vector<1x8x1xf32>
    %76 = vector.shape_cast %75 : vector<1x8x1xf32> to vector<8x1xf32>
    %77 = vector.extract_strided_slice %2 {offsets = [7, 0, 0], sizes = [1, 1, 256], strides = [1, 1, 1]} : vector<9x1x256xf32> to vector<1x1x256xf32>
    %78 = vector.shape_cast %77 : vector<1x1x256xf32> to vector<1x256xf32>
    %79 = vector.broadcast %76 : vector<8x1xf32> to vector<8x256xf32>
    %80 = vector.broadcast %78 : vector<1x256xf32> to vector<8x256xf32>
    %81 = arith.mulf %79, %80 : vector<8x256xf32>
    %82 = vector.shape_cast %81 : vector<8x256xf32> to vector<1x8x256xf32>
    %83 = arith.mulf %74, %82 : vector<1x8x256xf32>
    %84 = arith.addf %73, %83 : vector<1x8x256xf32>
    %c239_i32 = arith.constant 239 : i32
    %85 = tpu.dynamic_rotate %0 by %c239_i32 dim 2 : vector<1x8x256xf32>, i32 -> vector<1x8x256xf32>
    %86 = vector.extract_strided_slice %1 {offsets = [8, 0, 0], sizes = [1, 8, 1], strides = [1, 1, 1]} : vector<9x8x1xf32> to vector<1x8x1xf32>
    %87 = vector.shape_cast %86 : vector<1x8x1xf32> to vector<8x1xf32>
    %88 = vector.extract_strided_slice %2 {offsets = [8, 0, 0], sizes = [1, 1, 256], strides = [1, 1, 1]} : vector<9x1x256xf32> to vector<1x1x256xf32>
    %89 = vector.shape_cast %88 : vector<1x1x256xf32> to vector<1x256xf32>
    %90 = vector.broadcast %87 : vector<8x1xf32> to vector<8x256xf32>
    %91 = vector.broadcast %89 : vector<1x256xf32> to vector<8x256xf32>
    %92 = arith.mulf %90, %91 : vector<8x256xf32>
    %93 = vector.shape_cast %92 : vector<8x256xf32> to vector<1x8x256xf32>
    %94 = arith.mulf %85, %93 : vector<1x8x256xf32>
    %95 = arith.addf %84, %94 : vector<1x8x256xf32>
    %cst = arith.constant dense<0.000000e+00> : vector<1x8xf32>
    %96 = vector.multi_reduction <add>, %95, %cst [2] : vector<1x8x256xf32> to vector<1x8xf32>
    %97 = vector.shape_cast %96 : vector<1x8xf32> to vector<1x8x1xf32>
    %cst_8 = arith.constant 3.906250e-03 : f32
    %98 = vector.broadcast %cst_8 : f32 to vector<1x8x1xf32>
    %99 = arith.mulf %97, %98 : vector<1x8x1xf32>
    %100 = arith.mulf %95, %95 : vector<1x8x256xf32>
    %cst_9 = arith.constant dense<0.000000e+00> : vector<1x8xf32>
    %101 = vector.multi_reduction <add>, %100, %cst_9 [2] : vector<1x8x256xf32> to vector<1x8xf32>
    %102 = vector.shape_cast %101 : vector<1x8xf32> to vector<1x8x1xf32>
    %cst_10 = arith.constant 3.906250e-03 : f32
    %103 = vector.broadcast %cst_10 : f32 to vector<1x8x1xf32>
    %104 = arith.mulf %102, %103 : vector<1x8x1xf32>
    %105 = arith.mulf %99, %99 : vector<1x8x1xf32>
    %106 = arith.subf %104, %105 : vector<1x8x1xf32>
    %cst_11 = arith.constant 0.000000e+00 : f32
    %107 = vector.broadcast %cst_11 : f32 to vector<1x8x1xf32>
    %108 = arith.maximumf %106, %107 : vector<1x8x1xf32>
    %c0_12 = arith.constant 0 : index
    %c0_13 = arith.constant 0 : index
    %c0_14 = arith.constant 0 : index
    %109 = vector.load %arg4[%c0_12, %c0_13, %c0_14] : memref<2x8x1xf32, #tpu.memory_space<vmem>>, vector<1x8x1xf32>
    %110 = vector.shape_cast %109 : vector<1x8x1xf32> to vector<8x1xf32>
    %c1 = arith.constant 1 : index
    %c0_15 = arith.constant 0 : index
    %c0_16 = arith.constant 0 : index
    %111 = vector.load %arg4[%c1, %c0_15, %c0_16] : memref<2x8x1xf32, #tpu.memory_space<vmem>>, vector<1x8x1xf32>
    %112 = vector.shape_cast %111 : vector<1x8x1xf32> to vector<8x1xf32>
    %cst_17 = arith.constant 9.99999974E-6 : f32
    %113 = vector.broadcast %cst_17 : f32 to vector<1x8x1xf32>
    %114 = arith.addf %108, %113 : vector<1x8x1xf32>
    %115 = math.rsqrt %114 : vector<1x8x1xf32>
    %116 = vector.shape_cast %110 : vector<8x1xf32> to vector<1x8x1xf32>
    %117 = arith.mulf %115, %116 : vector<1x8x1xf32>
    %118 = arith.mulf %99, %117 : vector<1x8x1xf32>
    %119 = vector.shape_cast %112 : vector<8x1xf32> to vector<1x8x1xf32>
    %120 = arith.subf %119, %118 : vector<1x8x1xf32>
    %121 = vector.broadcast %117 : vector<1x8x1xf32> to vector<1x8x256xf32>
    %122 = arith.mulf %95, %121 : vector<1x8x256xf32>
    %123 = vector.broadcast %120 : vector<1x8x1xf32> to vector<1x8x256xf32>
    %124 = arith.addf %122, %123 : vector<1x8x256xf32>
    %c0_18 = arith.constant 0 : index
    %c0_19 = arith.constant 0 : index
    %125 = vector.load %arg5[%c0_18, %c0_19] : memref<16x8xf32, #tpu.memory_space<vmem>>, vector<16x8xf32>
    %126 = vector.shape_cast %124 : vector<1x8x256xf32> to vector<8x256xf32>
    %cst_20 = arith.constant dense<0.000000e+00> : vector<16x256xf32>
    %127 = tpu.matmul %125, %126, %cst_20 {dimension_numbers = #tpu.dot_dimension_numbers<[1], [0], [0], [1], [0, 0, 1, 1], [], []>} : vector<16x8xf32>, vector<8x256xf32>, vector<16x256xf32> -> vector<16x256xf32>
    %c0_21 = arith.constant 0 : index
    %c0_22 = arith.constant 0 : index
    %c0_23 = arith.constant 0 : index
    %128 = vector.load %arg6[%c0_21, %c0_22, %c0_23] : memref<1x16x256xf32, #tpu.memory_space<vmem>>, vector<1x16x256xf32>
    %129 = vector.shape_cast %128 : vector<1x16x256xf32> to vector<16x256xf32>
    %130 = vector.shape_cast %127 : vector<16x256xf32> to vector<1x16x256xf32>
    tpu.vector_store %arg6[%c0_21, %c0_22, %c0_23], %130 {strides = array<i32>} : memref<1x16x256xf32, #tpu.memory_space<vmem>>, vector<1x16x256xf32>,
    return
  }
  func.func @transform_0(%arg0: i32) -> (i32, i32, i32) {
    %c0_i32 = arith.constant 0 : i32
    %c0_i32_0 = arith.constant 0 : i32
    %c0_i32_1 = arith.constant 0 : i32
    return %arg0, %c0_i32, %c0_i32_0 : i32, i32, i32
  }
  func.func @transform_1(%arg0: i32) -> (i32, i32, i32) {
    %c0_i32 = arith.constant 0 : i32
    %c0_i32_0 = arith.constant 0 : i32
    %c0_i32_1 = arith.constant 0 : i32
    %c0_i32_2 = arith.constant 0 : i32
    return %c0_i32, %c0_i32_0, %c0_i32_1 : i32, i32, i32
  }
  func.func @transform_2(%arg0: i32) -> (i32, i32, i32) {
    %c0_i32 = arith.constant 0 : i32
    %c0_i32_0 = arith.constant 0 : i32
    %c0_i32_1 = arith.constant 0 : i32
    %c0_i32_2 = arith.constant 0 : i32
    return %c0_i32, %c0_i32_0, %c0_i32_1 : i32, i32, i32
  }
  func.func @transform_3(%arg0: i32) -> (i32, i32, i32) {
    %c0_i32 = arith.constant 0 : i32
    %c0_i32_0 = arith.constant 0 : i32
    %c0_i32_1 = arith.constant 0 : i32
    %c0_i32_2 = arith.constant 0 : i32
    return %c0_i32, %c0_i32_0, %c0_i32_1 : i32, i32, i32
  }
  func.func @transform_4(%arg0: i32) -> (i32, i32) {
    %c0_i32 = arith.constant 0 : i32
    %c0_i32_0 = arith.constant 0 : i32
    %c0_i32_1 = arith.constant 0 : i32
    return %c0_i32, %c0_i32_0 : i32, i32
  }
  func.func @transform_5(%arg0: i32) -> (i32, i32, i32) {
    %c0_i32 = arith.constant 0 : i32
    %c0_i32_0 = arith.constant 0 : i32
    %c0_i32_1 = arith.constant 0 : i32
    return %arg0, %c0_i32, %c0_i32_0 : i32, i32, i32
  }
}

</mosaic_0001>

<bundles_post_ra>
// kernel: tpu_custom_call.1
= control target key start
LH: loop header
LB: loop body
LE: loop exit
PB: predicated region body
PF: predicated region fallthrough
CT: control target
= control target key end

     0   :  { %10 = vsyncpa [#allocation3], 0  ;;  %s1136_s0 = inlined_call_operand.vmem [shape: f32[2,8,256], index: 0, kind: input, shape index: {}]   ;;  %s1137_s1 = inlined_call_operand.vmem [shape: f32[9,8,1], index: 1, kind: input, shape index: {}]   ;;  %s1138_s2 = inlined_call_operand.vmem [shape: f32[9,1,256], index: 2, kind: input, shape index: {}]   ;;  %s1139_s3 = inlined_call_operand.vmem [shape: f32[2,8,1], index: 3, kind: input, shape index: {}]   ;;  %s1140_s4 = inlined_call_operand.vmem [shape: f32[16,8], index: 4, kind: input, shape index: {}]   ;;  %s1141_s5 = inlined_call_operand.hbm [shape: f32[2,16,256], index: 5, kind: output, shape index: {}]  }
   0x1   :  { %12 = vsyncpa [#allocation3 + $0x1], 0  ;;  %s863_s18 = smov 0   ;;  %s865_s19 = smov 0  }
   0x2   :  { %s867_s20 = smov 0   ;;  %s869_s21 = smov 0  }
   0x3 LB: > { %s884_s22 = sadd.s32 4294967295, %s819_s21   ;;  %s684_s23 = sadd.s32 4294967294, %s819_s21   ;;  %s819_s21 = sphi %s869_s21, %s1147_s21   ;;  %s815_s20 = sphi %s867_s20, %s1146_s20   ;;  %s811_s19 = sphi %s865_s19, %s1145_s19   ;;  %s807_s18 = sphi %s863_s18, %s1144_s18  }
   0x4   : > { %s888_s24 = sadd.s32 1, %s819_s21   ;;  %s135_s25 = sadd.s32 1, %s815_s20 }
   0x5   : > { %s132_s26 = ssub.s32 %s819_s21, %s888_s24  ;;  %p145_p0 = scmp.ne.s32.totalorder %s815_s20, %s811_s19 }
   0x6   : > { %p133_p1 = scmp.eq.s32.totalorder %s132_s26, 0  ;;  %p146_p2 = scmp.eq.s32.totalorder %s884_s22, 1 }
   0x7   : > { %p151_p3 = scmp.ne.s32.totalorder %s811_s19, %s807_s18  ;;  %p152_p4 = scmp.eq.s32.totalorder %s684_s23, 1 }
   0x8   : > { %s899_s27 = scalar_select %p133_p1, %s815_s20, %s135_s25  }
   0x9   : > { %p901_p5 = por %p146_p2, %p145_p0  ;;  %p905_p6 = por %p152_p4, %p151_p3 }
   0xa   : > { %p687_p7 = scmp.ge.s32.totalorder %s819_s21, 1  ;;  %p190_p8 = scmp.lt.s32.totalorder %s819_s21, 3 }
   0xc   : > { %p191_p9 = pnand %p687_p7, %p190_p8 }
   0xd   : > { %v226_v0 = vld [vmem:[%s1137_s1 + $0x8] sm:$0xff] (!%p191_p9)  ;;  %v225_v1 = vld [vmem:[%s1137_s1] sm:$0xff] (!%p191_p9)  ;;  %p218_p10 = scmp.lt.s32.totalorder (!%p191_p9), %s884_s22, 1  ;;  %v821_v2 = vmov (!%p191_p9), 0   ;;  %v227_v3 = vld [vmem:[%s1137_s1 + $0x10] sm:$0xff] (!%p191_p9)  ;;  %s822_s26 = smov (!%p191_p9), 17   ;;  %v253_v20 = vlaneseq (!%p191_p9) }
   0xe   : > { %194 = sbr.rel (%p191_p9) target bundleno = 727 (0x2d7), region = 40  ;;  %754 = vset.pattern.permute.xlu1 (!%p191_p9), %v821_v2  ;;  %753 = vset.pattern.permute.xlu0 (!%p191_p9), %v821_v2  ;;  %v229_v4 = vld [vmem:[%s1137_s1 + $0x20] sm:$0xff] (!%p191_p9)  ;;  %v228_v5 = vld [vmem:[%s1137_s1 + $0x18] sm:$0xff] (!%p191_p9)  ;;  %v230_v8 = vld [vmem:[%s1137_s1 + $0x28] sm:$0xff] (!%p191_p9)  ;;  %s823_s7 = smov (!%p191_p9), 16   ;;  %vm520_vm8 = vcmask (!%p191_p9), 64512  }
   0xf   : > { %289 = vperm.xlu1 (!%p191_p9), %754, %v226_v0   ;;  %260 = vperm.xlu0 (!%p191_p9), %753, %v225_v1   ;;  %v231_v9 = vld [vmem:[%s1137_s1 + $0x30] sm:$0xff] (!%p191_p9)  ;;  %s824_s10 = smov (!%p191_p9), 15   ;;  %v232_v10 = vld [vmem:[%s1137_s1 + $0x38] sm:$0xff] (!%p191_p9)  ;;  %s825_s13 = smov (!%p191_p9), 1   ;;  %v233_v11 = vld [vmem:[%s1137_s1 + $0x40] sm:$0xff] (!%p191_p9)  ;;  %v265_v23 = vshrl.u32 (!%p191_p9), %v253_v20, 7 }
  0x10   : > { %s826_s16 = smov (!%p191_p9), 127   ;;  %s828_s23 = smov (!%p191_p9), 112   ;;  %v235_v26 = vld [vmem:[%s1138_s2 + $0x2] sm:$0x3] (!%p191_p9)  ;;  %v980_v29 = vand.u32 (!%p191_p9), 127, %v253_v20 }
  0x11   : > { %s829_s25 = smov (!%p191_p9), 111   ;;  %v976_v27 = vsub.s32 (!%p191_p9), 0, %v265_v23  ;;  %v978_v28 = vsub.s32 (!%p191_p9), 1, %v265_v23  ;;  %v234_v32 = vld [vmem:[%s1138_s2] sm:$0x3] (!%p191_p9)  ;;  %s831_s8 = smov (!%p191_p9), [#allocation2]  }
  0x12   : > { %v236_v33 = vld [vmem:[%s1138_s2 + $0x4] sm:$0x3] (!%p191_p9)  ;;  %v237_v34 = vld [vmem:[%s1138_s2 + $0x6] sm:$0x3] (!%p191_p9)  ;;  %v238_v35 = vld [vmem:[%s1138_s2 + $0xa] sm:$0x3] (!%p191_p9) }
  0x13   : > { %318 = vperm.xlu1 (!%p191_p9), %754, %v227_v3   ;;  %244 = vperm.xlu0 (!%p191_p9), %753, %v229_v4   ;;  %v296_v36 = vrot.slane (!%p191_p9), %v235_v26, %v976_v27  ;;  %v300_v37 = vrot.slane (!%p191_p9), %v235_v26, %v978_v28  ;;  %v1001_v38 = vld [vmem:[%s1138_s2 + $0xc] sm:$0x3] (!%p191_p9)  ;;  %v267_v39 = vrot.slane (!%p191_p9), %v234_v32, %v976_v27  ;;  %vm255_vm0 = vcmp.lt.s32.totalorder (!%p191_p9), %v980_v29, 17  ;;  %v1010_v42 = vld [vmem:[%s1138_s2 + $0xe] sm:$0x3] (!%p191_p9) }
  0x14   : > { %v271_v40 = vrot.slane (!%p191_p9), %v234_v32, %v978_v28  ;;  %v325_v41 = vrot.slane (!%p191_p9), %v236_v33, %v976_v27  ;;  %v329_v45 = vrot.slane (!%p191_p9), %v236_v33, %v978_v28  ;;  %v354_v46 = vrot.slane (!%p191_p9), %v237_v34, %v976_v27 }
  0x15   : > { %s219_s9 = scalar_select %p218_p10, %s884_s22, 1  ;;  %v358_v47 = vrot.slane %v237_v34, %v978_v28  ;;  %v383_v48 = vrot.slane %v238_v35, %v976_v27  ;;  %v387_v49 = vrot.slane %v238_v35, %v978_v28  ;;  %vm284_vm1 = vcmp.lt.s32.totalorder %v980_v29, 16  ;;  %v241_v34 = vld [vmem:[%s1138_s2 + $0x10] sm:$0x3] }
  0x16   : > { %v412_v50 = vrot.slane %v1001_v38, %v976_v27  ;;  %v416_v51 = vrot.slane %v1001_v38, %v978_v28  ;;  %vm313_vm2 = vcmp.lt.s32.totalorder %v980_v29, 15  ;;  %v441_v54 = vrot.slane %v1010_v42, %v976_v27 }
  0x17   : > { %s699_s14 = sshll.u32 %s219_s9, 4  ;;  %347 = vperm.xlu0 %753, %v228_v5   ;;  %v445_v57 = vrot.slane %v1010_v42, %v978_v28  ;;  %vm342_vm3 = vcmp.lt.s32.totalorder %v980_v29, 1  ;;  %vm371_vm4 = vcmp.lt.s32.totalorder %v980_v29, 127  ;;  %vm400_vm5 = vcmp.lt.s32.totalorder %v980_v29, 113  ;;  %s761_s9 = sshll.u32 %s831_s8, 4  ;;  %s762_s9 = int_to_ptr.vmem [resolvable:$false] %s761_s9 }
  0x18   : > { %s222_s17 = scalar_lea.vmem %s1136_s0, %s699_s14  ;;  %vm429_vm6 = vcmp.lt.s32.totalorder %v980_v29, 112  ;;  %vm458_vm7 = vcmp.lt.s32.totalorder %v980_v29, 111  ;;  %s215_s14 = sand.u32 1, %s811_s19  }
  0x19   : > { %v931_v6 = vld [vmem:[%s222_s17] sm:$0xff]  ;;  %v934_v7 = vld [vmem:[%s222_s17 + $0x8] sm:$0xff]  ;;  %s827_s17 = smov 113   ;;  %s688_s15 = sshll.u32 %s215_s14, 5 }
  0x1a   : > { %249 = vrot.lane.b32.xlu1 %v931_v6, %s822_s26  ;;  %s1094_s6 = scalar_lea.sflag [#allocation3], %s215_s14 }
  0x1b   : > { %251 = vrot.lane.b32.xlu0 %v934_v7, %s822_s26 }
  0x1e   : > { %376 = vperm.xlu1 %754, %v230_v8  }
  0x1f   : > { %280 = vrot.lane.b32.xlu0 %v931_v6, %s823_s7 }
  0x22   : > { %282 = vrot.lane.b32.xlu1 %v934_v7, %s823_s7 }
  0x23   : > { %405 = vperm.xlu0 %753, %v231_v9  }
  0x26   : > { %309 = vrot.lane.b32.xlu1 %v931_v6, %s824_s10 }
  0x27   : > { %311 = vrot.lane.b32.xlu0 %v934_v7, %s824_s10  ;;  %s763_s10 = scalar_lea.vmem %s762_s9, 1024 }
  0x2a   : > { %434 = vperm.xlu1 %754, %v232_v10  }
  0x2b   : > { %338 = vrot.lane.b32.xlu0 %v931_v6, %s825_s13 }
  0x2e   : > { %340 = vrot.lane.b32.xlu1 %v934_v7, %s825_s13 }
  0x2f   : > { %463 = vperm.xlu0 %753, %v233_v11  }
  0x32   : > { %367 = vrot.lane.b32.xlu1 %v931_v6, %s826_s16 }
  0x33   : > { %369 = vrot.lane.b32.xlu0 %v934_v7, %s826_s16  ;;  %s217_s16 = scalar_lea.vmem [#allocation2], %s688_s15 }
  0x36   : > { %396 = vrot.lane.b32.xlu1 %v931_v6, %s827_s17 }
  0x37   : > { %398 = vrot.lane.b32.xlu0 %v934_v7, %s827_s17  ;;  %s622_s17 = sshll.u32 %s217_s16, 4  ;;  %s1087_s17 = int_to_ptr.vmem [resolvable:$true] %s622_s17 }
  0x38   : > { %p764_p0 = scmp.lt.s32.totalorder %s1087_s17, %s762_s9 }
  0x3a   : > { %425 = vrot.lane.b32.xlu1 %v931_v6, %s828_s23 }
  0x3b   : > { %427 = vrot.lane.b32.xlu0 %v934_v7, %s828_s23  ;;  %s700_s23 = sshll.u32 %s884_s22, 9  ;;  %s757_s22 = scalar_lea.vmem %s1087_s17, 512 }
  0x3c   : > { %s1092_s30 = scalar_lea.hbm %s1141_s5, %s700_s23  ;;  %p758_p11 = scmp.ne.s32.totalorder %s1087_s17, %s757_s22 }
  0x3d   : > { %p765_p1 = scmp.lt.s32.totalorder %s763_s10, %s757_s22 }
  0x3e   : > { %454 = vrot.lane.b32.xlu1 %v931_v6, %s829_s25  ;;  %p759_p12 = pnand %p758_p11, %p901_p5 }
  0x3f   : > { %456 = vrot.lane.b32.xlu0 %v934_v7, %s829_s25  ;;  %p766_p2 = por %p765_p1, %p764_p0 }
  0x40   : > { %p760_p13 = pneg %p759_p12 }
  0x42   : > { %p767_p3 = pnand %p766_p2, %p760_p13 }
  0x8e   : > { %v290_v12 = vpop.permute.xlu1 %289  ;;  %v261_v13 = vpop.permute.xlu0 %260 }
  0x8f   : > { %v274_v55 = vmul.f32 %v267_v39, %v261_v13  ;;  %v275_v56 = vmul.f32 %v271_v40, %v261_v13  ;;  %v303_v62 = vmul.f32 %v296_v36, %v290_v12  ;;  %v304_v63 = vmul.f32 %v300_v37, %v290_v12 }
  0x92   : > { %v319_v14 = vpop.permute.xlu1 %318  ;;  %v965_v15 = vpop.permute.xlu0 %244 }
  0x93   : > { %v332_v2 = vmul.f32 %v325_v41, %v319_v14  ;;  %v333_v3 = vmul.f32 %v329_v45, %v319_v14  ;;  %v247_v8 = vmul.f32 %v965_v15, %v931_v6  ;;  %v248_v9 = vmul.f32 %v965_v15, %v934_v7 }
  0x96   : > { %v967_v16 = vpop.permute.xlu0 %347  ;;  %v250_v17 = vpop.permute.xlu1 %249 }
  0x97   : > { %v362_v14 = vmul.f32 %v358_v47, %v967_v16  ;;  %v474_v47 = vrot.slane %v241_v34, %v978_v28 }
  0x9a   : > { %v252_v18 = vpop.permute.xlu0 %251 }
  0x9b   : > { %v256_v52 = vsel %vm255_vm0, %v250_v17, %v252_v18  ;;  %v257_v53 = vsel %vm255_vm0, %v252_v18, %v250_v17  ;;  %v361_v17 = vmul.f32 %v354_v46, %v967_v16  ;;  %v470_v46 = vrot.slane %v241_v34, %v976_v27 }
  0x9c   : > { %v276_v0 = vmul.f32 %v274_v55, %v257_v53  ;;  %v277_v1 = vmul.f32 %v275_v56, %v256_v52 }
  0x9d   : > { %v969_v19 = vpop.permute.xlu1 %376 }
  0x9e   : > { %v281_v21 = vpop.permute.xlu0 %280  ;;  %v390_v7 = vmul.f32 %v383_v48, %v969_v19  ;;  %v391_v15 = vmul.f32 %v387_v49, %v969_v19 }
  0xa1   : > { %v283_v22 = vpop.permute.xlu1 %282 }
  0xa2   : > { %v971_v24 = vpop.permute.xlu0 %405  ;;  %v285_v60 = vsel %vm284_vm1, %v281_v21, %v283_v22  ;;  %v286_v61 = vsel %vm284_vm1, %v283_v22, %v281_v21  ;;  %v278_v21 = vadd.f32 %v276_v0, %v247_v8  ;;  %v279_v22 = vadd.f32 %v277_v1, %v248_v9 }
  0xa3   : > { %v305_v10 = vmul.f32 %v303_v62, %v286_v61  ;;  %v306_v11 = vmul.f32 %v304_v63, %v285_v60  ;;  %v419_v37 = vmul.f32 %v412_v50, %v971_v24  ;;  %v420_v19 = vmul.f32 %v416_v51, %v971_v24 }
  0xa5   : > { %v310_v25 = vpop.permute.xlu1 %309  ;;  %v307_v26 = vadd.f32 %v305_v10, %v278_v21  ;;  %v496_v21 = vld [vmem:[%s1139_s3] sm:$0xff] }
  0xa6   : > { %v312_v30 = vpop.permute.xlu0 %311 }
  0xa7   : > { %v314_v4 = vsel %vm313_vm2, %v310_v25, %v312_v30  ;;  %v315_v5 = vsel %vm313_vm2, %v312_v30, %v310_v25  ;;  %v308_v30 = vadd.f32 %v306_v11, %v279_v22 }
  0xa8   : > { %v334_v6 = vmul.f32 %v332_v2, %v315_v5  ;;  %v335_v23 = vmul.f32 %v333_v3, %v314_v4 }
  0xa9   : > { %v982_v31 = vpop.permute.xlu1 %434 }
  0xaa   : > { %v339_v43 = vpop.permute.xlu0 %338  ;;  %v336_v40 = vadd.f32 %v334_v6, %v307_v26  ;;  %v337_v41 = vadd.f32 %v335_v23, %v308_v30  ;;  %v449_v45 = vmul.f32 %v445_v57, %v982_v31  ;;  %v691_v23 = vld [vmem:[%s1139_s3 + $0x8] sm:$0xff] }
  0xad   : > { %v341_v44 = vpop.permute.xlu1 %340 }
  0xae   : > { %v1028_v58 = vpop.permute.xlu0 %463  ;;  %v343_v18 = vsel %vm342_vm3, %v339_v43, %v341_v44  ;;  %v344_v20 = vsel %vm342_vm3, %v341_v44, %v339_v43  ;;  %v448_v44 = vmul.f32 %v441_v54, %v982_v31 }
  0xaf   : > { %v363_v32 = vmul.f32 %v361_v17, %v344_v20  ;;  %v364_v33 = vmul.f32 %v362_v14, %v343_v18  ;;  %v477_v28 = vmul.f32 %v470_v46, %v1028_v58  ;;  %v478_v57 = vmul.f32 %v474_v47, %v1028_v58 }
  0xb1   : > { %v368_v59 = vpop.permute.xlu1 %367  ;;  %v365_v48 = vadd.f32 %v363_v32, %v336_v40  ;;  %v366_v24 = vadd.f32 %v364_v33, %v337_v41 }
  0xb2   : > { %v370_v12 = vpop.permute.xlu0 %369 }
  0xb3   : > { %v372_v25 = vsel %vm371_vm4, %v368_v59, %v370_v12  ;;  %v373_v16 = vsel %vm371_vm4, %v370_v12, %v368_v59 }
  0xb4   : > { %v392_v42 = vmul.f32 %v390_v7, %v372_v25  ;;  %v393_v43 = vmul.f32 %v391_v15, %v373_v16  ;;  %v830_v25 = vmov 0.0  }
  0xb5   : > { %v397_v13 = vpop.permute.xlu1 %396  ;;  %591 = vmatprep.mubr.f32.mxu0 %v830_v25  ;;  %597 = vmatprep.mubr.f32.mxu1 %v830_v25 }
  0xb6   : > { %v399_v35 = vpop.permute.xlu0 %398  ;;  %v394_v54 = vadd.f32 %v392_v42, %v365_v48  ;;  %v395_v55 = vadd.f32 %v393_v43, %v366_v24 }
  0xb7   : > { %v401_v38 = vsel %vm400_vm5, %v397_v13, %v399_v35  ;;  %v402_v39 = vsel %vm400_vm5, %v399_v35, %v397_v13  ;;  %v518_v35 = vld [vmem:[%s1140_s4] sm:$0xff] }
  0xb8   : > { %v421_v49 = vmul.f32 %v419_v37, %v401_v38  ;;  %v422_v50 = vmul.f32 %v420_v19, %v402_v39 }
  0xb9   : > { %v426_v36 = vpop.permute.xlu1 %425 }
  0xba   : > { %v428_v51 = vpop.permute.xlu0 %427  ;;  %v423_v59 = vadd.f32 %v421_v49, %v394_v54  ;;  %v424_v60 = vadd.f32 %v422_v50, %v395_v55 }
  0xbb   : > { %v430_v52 = vsel %vm429_vm6, %v426_v36, %v428_v51  ;;  %v431_v53 = vsel %vm429_vm6, %v428_v51, %v426_v36  ;;  %v519_v36 = vld [vmem:[%s1140_s4 + $0x8] sm:$0xff] }
  0xbc   : > { %v450_v31 = vmul.f32 %v448_v44, %v430_v52  ;;  %v451_v56 = vmul.f32 %v449_v45, %v431_v53 }
  0xbd   : > { %v455_v27 = vpop.permute.xlu1 %454 }
  0xbe   : > { %v457_v61 = vpop.permute.xlu0 %456  ;;  %v452_v0 = vadd.f32 %v450_v31, %v423_v59  ;;  %v453_v1 = vadd.f32 %v451_v56, %v424_v60 }
  0xbf   : > { %v459_v62 = vsel %vm458_vm7, %v455_v27, %v457_v61  ;;  %v460_v63 = vsel %vm458_vm7, %v457_v61, %v455_v27 }
  0xc0   : > { %v479_v2 = vmul.f32 %v477_v28, %v459_v62  ;;  %v480_v3 = vmul.f32 %v478_v57, %v460_v63 }
  0xc2   : > { %v481_v4 = vadd.f32 %v479_v2, %v452_v0  ;;  %v482_v29 = vadd.f32 %v480_v3, %v453_v1 }
  0xc4   : > { %v483_v5 = vadd.f32 %v482_v29, %v481_v4  ;;  %v487_v8 = vmul.f32 %v481_v4, %v481_v4  ;;  %v488_v9 = vmul.f32 %v482_v29, %v482_v29 }
  0xc6   : > { %484 = vadd.xlane.f32.xlu1 %v483_v5  ;;  %v489_v10 = vadd.f32 %v488_v9, %v487_v8 }
  0xc8   : > { %490 = vadd.xlane.f32.xlu0 %v489_v10 }
 0x153   : > { %v485_v11 = vpop.xlane.xlu1 %484 }
 0x154   : > { %v486_v12 = vmul.f32 0.00390625, %v485_v11 }
 0x155   : > { %v491_v58 = vpop.xlane.xlu0 %490 }
 0x156   : > { %v493_v13 = vmul.f32 %v486_v12, %v486_v12  ;;  %v492_v17 = vmul.f32 0.00390625, %v491_v58 }
 0x158   : > { %v494_v14 = vsub.f32 %v492_v17, %v493_v13 }
 0x15a   : > { %v495_v18 = vmax.f32 %v494_v14, 0.0 }
 0x15c   : > { %v499_v20 = vadd.f32 1e-05, %v495_v18 }
 0x15e   : > { %755 = vrsqrt.f32 %v499_v20 }
 0x168   : > { %v756_v22 = vpop.eup %755 }
 0x169   : > { %v501_v6 = vmul.f32 %v756_v22, %v496_v21 }
 0x16b   : > { %506 = vperm.xlu0 %753, %v501_v6   ;;  %v502_v7 = vmul.f32 %v501_v6, %v486_v12 }
 0x16d   : > { %v503_v15 = vsub.f32 %v691_v23, %v502_v7 }
 0x16f   : > { %513 = vperm.xlu1 %754, %v503_v15  }
 0x1ea   : > { %v507_v16 = vpop.permute.xlu0 %506 }
 0x1eb   : > { %v509_v26 = vmul.f32 %v507_v16, %v481_v4  ;;  %v510_v30 = vmul.f32 %v507_v16, %v482_v29 }
 0x1ee   : > { %v514_v32 = vpop.permute.xlu1 %513 }
 0x1ef   : > { %v516_v33 = vadd.f32 %v514_v32, %v509_v26  ;;  %v517_v34 = vadd.f32 %v514_v32, %v510_v30 }
 0x1f1   : > { %527 = vmatprep.subr.mxu0 %v517_v34  ;;  %701 = vmatprep.subr.mxu1 %v517_v34 }
 0x1f2   : > { %528 = vmatpush1.msra.mxu0 %v516_v33  ;;  %702 = vmatpush1.msra.mxu1 %v516_v33 }
 0x1f3   : > { %692 = vmatmul.mubr.msk.f32.vlgmr.msra.gmra.mrb[0].mxu0 %vm520_vm8, %v518_v35  ;;  %693 = vmatmul.mubr.msk.f32.vlgmr.msra.gmra.mrb[0].mxu1 %vm520_vm8, %v519_v36 }
 0x2c6   : > { %v593_v37 = vpop.f32.mrb[0].mxu0  ;;  %v599_v19 = vpop.f32.mrb[0].mxu1 }
 0x2c7   : > { %604 = vst [vmem:[%s217_s16] sm:$0xff] %v593_v37  ;;  %606 = vst [vmem:[%s217_s16 + $0x10] sm:$0xff] %v599_v19  ;;  %v595_v38 = vpop.f32.mrb[1].mxu0  ;;  %v601_v39 = vpop.f32.mrb[1].mxu1 }
 0x2c8   : > { %605 = vst [vmem:[%s217_s16 + $0x8] sm:$0xff] %v595_v38  ;;  %607 = vst [vmem:[%s217_s16 + $0x18] sm:$0xff] %v601_v39 }
 0x2c9   : > { %770 = shalt.err (!%p767_p3)
}
 0x2ca   : > { %s771_s11 = scalar_lea.hbm %s1092_s30, 512  ;;  %s775_s14 = scalar_lea.hbm %s1141_s5, 1024 }
 0x2cb   : > { %p772_p4 = scmp.ne.s32.totalorder %s1092_s30, %s771_s11  ;;  %p776_p9 = scmp.lt.u32.totalorder %s1092_s30, %s1141_s5 }
 0x2cc   : > { %p777_p10 = scmp.lt.u32.totalorder %s775_s14, %s771_s11  ;;  %p779_p12 = scmp.lt.u32.totalorder %s771_s11, %s1092_s30 }
 0x2cd   : > { %p773_p7 = pnand %p772_p4, %p901_p5 }
 0x2ce   : > { %p778_p11 = por %p777_p10, %p776_p9 }
 0x2cf   : > { %p774_p8 = pneg %p773_p7 }
 0x2d0   : > { %p780_p13 = por %p779_p12, %p778_p11 }
 0x2d2   : > { %p781_p0 = pnand %p780_p13, %p774_p8 }
 0x2d4   : > { %784 = shalt.err (!%p781_p0)
}
 0x2d5   : > { %s832_s23 = smov 256  }
 0x2d6   : > { %703 = dma.vmem_to_hbm [thread:$0]  (%p901_p5), %s1087_s17, 512, %s1092_s30, %s1094_s6, %s832_s23, %s832_s23, %s823_s7  }
 0x2d7 PF: > { %p709_p1 = scmp.ge.s32.totalorder %s819_s21, 2  ;;  %s637_s25 = sand.u32 1, %s807_s18  }
 0x2d8   : > { %s638_s26 = scalar_lea.sflag [#allocation3], %s637_s25 }
 0x2d9   : > { %p706_p2 = pnand %p709_p1, %p905_p6 }
 0x2db   : > { %802 = dma.done.wait (!%p706_p2), %s638_s26, 512  }
 0x2dc   : > { %804 = vsyncadd (!%p706_p2), %s638_s26, 4294966784  ;;  %p15_p3 = scmp.ge.s32.totalorder %s888_s24, 4   ;;  %s1144_s18 = smov %s811_s19 }
 0x2dd   : > { %s1145_s19 = smov %s815_s20  ;;  %s1146_s20 = smov %s899_s27 }
 0x2de   : > { %s1147_s21 = smov %s888_s24  ;;  %17 = sbr.rel (!%p15_p3) target bundleno = 3 (0x3), region = 76 }
 0x2e5   :  { %643 = vsyncpa [#allocation3], 1 }
 0x2e6   :  { %645 = vsyncpa [#allocation3 + $0x1], 1 }

</bundles_post_ra>
